<compile_context>
chip_gen: v6e
topology: v6e:2x2x1
jax: 0.10.0
libtpu: 0.0.40
codegen_flags: <defaults>
</compile_context>

<pallas_src>
import functools

import jax
import jax.numpy as jnp
from jax.experimental import pallas as pl
from jax.experimental.pallas import tpu as pltpu


def _round_up(x, m):
    return (x + m - 1) // m * m


def _vmem_limit_bytes():
    """Per-generation VMEM limit: ~80% of physical (100 MiB v5e/v6e, 51 MiB v7x)."""
    cap = 0
    try:
        info = pltpu.get_tpu_info()
        cap = int(getattr(info, "vmem_capacity_bytes", 0) or 0)
    except Exception:
        cap = 0
    if cap <= 0:
        kind = ""
        try:
            kind = jax.devices()[0].device_kind.lower()
        except Exception:
            pass
        cap = (64 << 20) if "v7" in kind else (128 << 20)
    return int(min(cap - (8 << 20), int(cap * 0.8)))


# ----------------------------- Pallas kernel -------------------------------
def lightgcn_kernel(emb0_hbm, adj_ref, scale_ref, out_ref, buf, acc, mm_acc,
                    *, gcn_layer, tm, tk, np_rows):
    """One grid step = one (layer l, row-tile i, k-tile k) partial matmul.

    emb0_hbm : (2*Np, Dp) bf16 HBM ref, laid out like `buf` (layer-0 rows in
               the first half, zeros in the second) so init is one whole-ref DMA.
    adj_ref  : (tm, tk) int8  -- streamed, double-buffered adjacency tile.
    scale_ref: (tm, 1)  f32   -- per-row dequant scales for this row tile.
    buf      : (2*Np, Dp) bf16 -- ping-pong layer buffers; rows [(l%2)*Np, ...)
               hold layer l, rows [((l+1)%2)*Np, ...) receive layer l+1.
    acc      : (Np, Dp)  f32   -- running sum of layer embeddings (mean numerator).
    mm_acc   : (tm, Dp)  f32   -- K-reduction accumulator for the current row tile.
    """
    l = pl.program_id(0)
    i = pl.program_id(1)
    k = pl.program_id(2)
    nk = pl.num_programs(2)

    # One-time init at the very first grid step: DMA the bf16 ego embedding
    # straight from HBM into the layer-0 ping-pong buffer (no resident f32
    # pipelined block), then seed the mean accumulator.
    @pl.when((l == 0) & (i == 0) & (k == 0))
    def _():
        pltpu.sync_copy(emb0_hbm, buf)                 # one-shot, whole buffer
        acc[...] = buf[0:np_rows, :].astype(jnp.float32)

    src = l % 2          # which half of buf holds layer l
    dst = (l + 1) % 2    # which half receives layer l + 1

    # New K reduction for this (layer, row-tile).
    @pl.when(k == 0)
    def _():
        mm_acc[...] = jnp.zeros_like(mm_acc)

    # Stream one int8 adjacency tile against the matching rows of layer l.
    # int8 -> bf16 cast is exact; per-row scale is folded in at commit time.
    src_off = pl.multiple_of(src * np_rows + k * tk, tk)
    prev = buf[pl.ds(src_off, tk), :]                  # (tk, Dp) bf16
    a_tile = adj_ref[...].astype(jnp.bfloat16)         # (tm, tk) bf16
    mm_acc[...] += jnp.dot(a_tile, prev, preferred_element_type=jnp.float32)

    # K reduction done: dequant-scale, commit layer-(l+1) rows, update the mean.
    @pl.when(k == nk - 1)
    def _():
        rows = mm_acc[...] * scale_ref[...]            # (tm, Dp) f32
        dst_off = pl.multiple_of(dst * np_rows + i * tm, tm)
        buf[pl.ds(dst_off, tm), :] = rows.astype(buf.dtype)
        acc_off = pl.multiple_of(i * tm, tm)
        acc[pl.ds(acc_off, tm), :] = acc[pl.ds(acc_off, tm), :] + rows

    # Last layer: emit the layer mean for this row tile (lane-dense f32 store).
    # NOTE: earlier layers flush untouched output blocks to HBM (stale VMEM);
    # benign only because the layer axis is outermost and strictly sequential.
    @pl.when((k == nk - 1) & (l == gcn_layer - 1))
    def _():
        acc_off = pl.multiple_of(i * tm, tm)
        out_ref[...] = (acc[pl.ds(acc_off, tm), :] *
                        (1.0 / float(gcn_layer + 1))).astype(out_ref.dtype)


# ------------------------------ wrapper -------------------------------------
def gbsr_forward(adj, ego_emb, *, num_user, num_item, gcn_layer,
                 tm_max=512, tk_max=2048):
    """Pallas-backed equivalent of GBSR.forward(adj_matrix)."""
    N, D = ego_emb.shape
    assert adj.shape == (N, N)
    assert gcn_layer >= 1
    assert tm_max % 128 == 0 and tk_max % 128 == 0 and tk_max % tm_max == 0

    Dp = _round_up(D, 128)                        # lane-dense embedding width
    Np0 = _round_up(N, 128)
    if Np0 >= tk_max:
        # Streamed-tile regime: prefer long tk (long contiguous HBM runs),
        # but shrink tk if zero-padding the (N, N) adjacency would exceed ~25%.
        tk = tk_max
        while tk > tm_max and _round_up(N, tk) * 4 > Np0 * 5:
            tk //= 2
        tm = min(tm_max, tk)
        Np = _round_up(N, tk)
    else:
        Np = Np0                                  # small-N: single tile per axis
        tm = tk = Np

    # Explicit VMEM budget check (scratch is the hard constraint on v7x).
    vmem_limit = _vmem_limit_bytes()
    scratch_bytes = (2 * Np * Dp * 2              # ping-pong bf16 layer buffers
                     + Np * Dp * 4                # f32 layer-sum accumulator
                     + tm * Dp * 4)               # f32 K-reduction accumulator
    pipeline_bytes = 2 * (tm * tk * 1             # double-buffered int8 adj tile
                          + tm * 4                # row-scale tile
                          + tm * Dp * 4)          # output block
    need = scratch_bytes + pipeline_bytes + (4 << 20)   # + compiler headroom
    if need > vmem_limit:
        raise ValueError(
            f"GBSR graph too large for VMEM: need ~{need >> 20} MiB "
            f"(Np={Np}, tm={tm}, tk={tk}) but the per-generation limit is "
            f"{vmem_limit >> 20} MiB")

    # int8 adjacency with per-row scales: the adjacency stream is >95% of HBM
    # bytes, so this halves traffic vs bf16 (4x vs f32).  Per-row scales keep
    # low-degree rows accurate; zero rows (isolated / padding) get scale 0.
    adj_f = adj.astype(jnp.float32)
    row_max = jnp.max(jnp.abs(adj_f), axis=1)                       # (N,)
    q_scale = jnp.where(row_max > 0, row_max / 127.0, 1.0)          # avoid /0
    adj_q = jnp.clip(jnp.round(adj_f / q_scale[:, None]),
                     -127.0, 127.0).astype(jnp.int8)

    adj_p = jnp.zeros((Np, Np), jnp.int8).at[:N, :N].set(adj_q)
    scale_p = jnp.zeros((Np, 1), jnp.float32).at[:N, 0].set(
        jnp.where(row_max > 0, q_scale, 0.0))
    # Ego embedding laid out exactly like the ping-pong scratch (layer-0 rows
    # in the first half) so the in-kernel init is a single whole-buffer DMA.
    emb_p = jnp.zeros((2 * Np, Dp), jnp.bfloat16).at[:N, :D].set(
        ego_emb.astype(jnp.bfloat16))

    grid = (gcn_layer, Np // tm, Np // tk)
    kernel = functools.partial(lightgcn_kernel, gcn_layer=gcn_layer,
                               tm=tm, tk=tk, np_rows=Np)

    mean_p = pl.pallas_call(
        kernel,
        out_shape=jax.ShapeDtypeStruct((Np, Dp), jnp.float32),
        grid_spec=pltpu.PrefetchScalarGridSpec(
            num_scalar_prefetch=0,
            grid=grid,
            in_specs=[
                # Ego embedding stays in HBM; copied once inside the kernel.
                pl.BlockSpec(memory_space=pl.ANY),
                # Streamed int8 adjacency tiles (1 MiB each, double-buffered).
                pl.BlockSpec((tm, tk), lambda l, i, k: (i, k)),
                # Per-row dequant scales for the current row tile.
                pl.BlockSpec((tm, 1), lambda l, i, k: (i, 0)),
            ],
            out_specs=pl.BlockSpec((tm, Dp), lambda l, i, k: (i, 0)),
            scratch_shapes=[
                pltpu.VMEM((2 * Np, Dp), jnp.bfloat16),   # ping-pong layer bufs
                pltpu.VMEM((Np, Dp), jnp.float32),        # layer-sum accumulator
                pltpu.VMEM((tm, Dp), jnp.float32),        # per-tile matmul acc
            ],
        ),
        compiler_params=pltpu.CompilerParams(
            # Layer & K axes are reductions; the row-tile axis carries state
            # through the shared ping-pong scratch, so no axis may be
            # megacore-'parallel' (per-core private scratch would break it).
            dimension_semantics=("arbitrary", "arbitrary", "arbitrary"),
            vmem_limit_bytes=vmem_limit,
        ),
        cost_estimate=pl.CostEstimate(
            flops=2 * gcn_layer * Np * Np * Dp,
            transcendentals=0,
            bytes_accessed=(gcn_layer * Np * Np          # int8 adjacency stream
                            + 2 * Np * Dp * 2            # one-shot ego DMA
                            + gcn_layer * Np * Dp * 4),  # output writebacks
        ),
    )(emb_p, adj_p, scale_p)

    mean_emb = mean_p[:N, :D]
    return mean_emb[:num_user], mean_emb[num_user:]


# ------------------------------ glue / setup --------------------------------
def build_normalized_adj(key, num_user, num_item, p_ui=0.10, p_uu=0.05):
    """Symmetric D^{-1/2} A D^{-1/2} adjacency for a random user-item graph plus
    user-user social edges (dense stand-in for dataset.get_uu_i_matrix())."""
    N = num_user + num_item
    k_ui, k_uu = jax.random.split(key)
    r = (jax.random.uniform(k_ui, (num_user, num_item)) < p_ui).astype(jnp.float32)
    s = (jax.random.uniform(k_uu, (num_user, num_user)) < p_uu).astype(jnp.float32)
    s = jnp.triu(s, k=1)
    s = s + s.T                                   # symmetric social block, no self-loops
    a = jnp.zeros((N, N), jnp.float32)
    a = a.at[:num_user, :num_user].set(s)
    a = a.at[:num_user, num_user:].set(r)
    a = a.at[num_user:, :num_user].set(r.T)
    deg = jnp.sum(a, axis=1)
    d_inv_sqrt = jnp.where(deg > 0, 1.0 / jnp.sqrt(jnp.maximum(deg, 1e-12)), 0.0)
    return a * d_inv_sqrt[:, None] * d_inv_sqrt[None, :]


def forward_reference(adj, ego_emb, gcn_layer):
    """Pure-JAX f32 reference mirroring the PyTorch forward."""
    all_emb = [ego_emb]
    for _ in range(gcn_layer):
        all_emb.append(adj @ all_emb[-1])
    return jnp.mean(jnp.stack(all_emb, axis=1), axis=1)


if __name__ == "__main__":
    # Small, deterministic configuration consistent with the module.
    num_user, num_item = 48, 80          # N = 128
    latent_dim = 32
    gcn_layer = 2

    key = jax.random.PRNGKey(0)
    k_adj, k_user, k_item = jax.random.split(key, 3)

    # init_type == 'norm': N(0, 0.01) embeddings (nn.Embedding weights).
    user_w = 0.01 * jax.random.normal(k_user, (num_user, latent_dim), jnp.float32)
    item_w = 0.01 * jax.random.normal(k_item, (num_item, latent_dim), jnp.float32)
    ego_emb = jnp.concatenate([user_w, item_w], axis=0)          # (N, D)

    adj = build_normalized_adj(k_adj, num_user, num_item)        # (N, N)

    user_emb, item_emb = gbsr_forward(
        adj, ego_emb, num_user=num_user, num_item=num_item, gcn_layer=gcn_layer
    )
    user_emb = jax.block_until_ready(user_emb)
    item_emb = jax.block_until_ready(item_emb)

    # Verify against the pure-JAX f32 reference (loose tolerance: the kernel
    # streams an int8 per-row-scaled adjacency and bf16 layer buffers, with
    # f32 MXU accumulation).
    ref = forward_reference(adj, ego_emb, gcn_layer)
    assert user_emb.shape == (num_user, latent_dim)
    assert item_emb.shape == (num_item, latent_dim)
    assert jnp.allclose(user_emb, ref[:num_user], atol=1e-3, rtol=1e-2)
    assert jnp.allclose(item_emb, ref[num_user:], atol=1e-3, rtol=1e-2)

    # TODO(synk): graph_learner / bpr_loss / hsic_graph are training-time loss
    # machinery (torch.rand Gumbel gating + sparse re-weighting), not part of
    # forward(); not ported to Pallas here.
    print("KERNEL_OK")
</pallas_src>

<mosaic_0001>
module attributes {stable_mosaic.version = 11 : i64} {
  func.func @lightgcn_kernel(%arg0: i32, %arg1: i32, %arg2: i32, %arg3: memref<256x128xbf16, #tpu.memory_space<any>>, %arg4: memref<128x128xi8, #tpu.memory_space<vmem>>, %arg5: memref<128x1xf32, #tpu.memory_space<vmem>>, %arg6: memref<128x128xf32, #tpu.memory_space<vmem>>, %arg7: memref<256x128xbf16, #tpu.memory_space<vmem>>, %arg8: memref<128x128xf32, #tpu.memory_space<vmem>>, %arg9: memref<128x128xf32, #tpu.memory_space<vmem>>) attributes {dimension_semantics = [#tpu.dimension_semantics<arbitrary>, #tpu.dimension_semantics<arbitrary>, #tpu.dimension_semantics<arbitrary>], iteration_bounds = array<i64: 2, 1, 1>, scalar_prefetch = 0 : i64, scratch_operands = 3 : i64, tpu.core_type = #tpu.core_type<tc>, window_params = [{}, {transform_indices = @transform_1, window_bounds = array<i64: 128, 128>}, {transform_indices = @transform_2, window_bounds = array<i64: 128, 1>}, {transform_indices = @transform_3, window_bounds = array<i64: 128, 128>}]} {
    %c0_i32 = arith.constant 0 : i32
    %0 = arith.cmpi eq, %arg0, %c0_i32 : i32
    %c0_i32_0 = arith.constant 0 : i32
    %1 = arith.cmpi eq, %arg1, %c0_i32_0 : i32
    %2 = arith.andi %0, %1 : i1
    %c0_i32_1 = arith.constant 0 : i32
    %3 = arith.cmpi eq, %arg2, %c0_i32_1 : i32
    %4 = arith.andi %2, %3 : i1
    %5 = arith.extui %4 : i1 to i32
    %c0_i32_2 = arith.constant 0 : i32
    %6 = arith.cmpi ne, %5, %c0_i32_2 : i32
    scf.if %6 {
      "tpu.region"() ({
        %54 = tpu.sem_alloc : memref<!tpu.dma_semaphore, #tpu.memory_space<semaphore_mem>>
        tpu.enqueue_dma source(%arg3 : memref<256x128xbf16, #tpu.memory_space<any>>) target(%arg7 : memref<256x128xbf16, #tpu.memory_space<vmem>>) target_semaphore(%54 : memref<!tpu.dma_semaphore, #tpu.memory_space<semaphore_mem>>)
        tpu.wait_dma2 semaphore(%54 : memref<!tpu.dma_semaphore, #tpu.memory_space<semaphore_mem>>) src(%arg3 : memref<256x128xbf16, #tpu.memory_space<any>>) dst(%arg7 : memref<256x128xbf16, #tpu.memory_space<vmem>>)
        tpu.yield
      }) : () -> ()
      %c0_28 = arith.constant 0 : index
      %c0_29 = arith.constant 0 : index
      %51 = vector.load %arg7[%c0_28, %c0_29] : memref<256x128xbf16, #tpu.memory_space<vmem>>, vector<128x128xbf16>
      %52 = arith.extf %51 : vector<128x128xbf16> to vector<128x128xf32>
      %c0_30 = arith.constant 0 : index
      %c0_31 = arith.constant 0 : index
      %53 = vector.load %arg8[%c0_30, %c0_31] : memref<128x128xf32, #tpu.memory_space<vmem>>, vector<128x128xf32>
      tpu.vector_store %arg8[%c0_30, %c0_31], %52 {strides = array<i32>} : memref<128x128xf32, #tpu.memory_space<vmem>>, vector<128x128xf32>,
    } else {
    }
    %c2_i32 = arith.constant 2 : i32
    %c0_i32_3 = arith.constant 0 : i32
    %7 = arith.cmpi eq, %c2_i32, %c0_i32_3 : i32
    %c1_i32 = arith.constant 1 : i32
    %8 = arith.select %7, %c1_i32, %c2_i32 : i32
    %9 = arith.remsi %arg0, %8 : i32
    %c0_i32_4 = arith.constant 0 : i32
    %10 = arith.cmpi ne, %9, %c0_i32_4 : i32
    %c0_i32_5 = arith.constant 0 : i32
    %11 = arith.cmpi slt, %9, %c0_i32_5 : i32
    %c0_i32_6 = arith.constant 0 : i32
    %12 = arith.cmpi slt, %8, %c0_i32_6 : i32
    %13 = arith.xori %11, %12 : i1
    %14 = arith.andi %13, %10 : i1
    %15 = arith.addi %9, %8 : i32
    %16 = arith.select %14, %15, %9 : i32
    %c1_i32_7 = arith.constant 1 : i32
    %17 = arith.addi %arg0, %c1_i32_7 : i32
    %c2_i32_8 = arith.constant 2 : i32
    %c0_i32_9 = arith.constant 0 : i32
    %18 = arith.cmpi eq, %c2_i32_8, %c0_i32_9 : i32
    %c1_i32_10 = arith.constant 1 : i32
    %19 = arith.select %18, %c1_i32_10, %c2_i32_8 : i32
    %20 = arith.remsi %17, %19 : i32
    %c0_i32_11 = arith.constant 0 : i32
    %21 = arith.cmpi ne, %20, %c0_i32_11 : i32
    %c0_i32_12 = arith.constant 0 : i32
    %22 = arith.cmpi slt, %20, %c0_i32_12 : i32
    %c0_i32_13 = arith.constant 0 : i32
    %23 = arith.cmpi slt, %19, %c0_i32_13 : i32
    %24 = arith.xori %22, %23 : i1
    %25 = arith.andi %24, %21 : i1
    %26 = arith.addi %20, %19 : i32
    %27 = arith.select %25, %26, %20 : i32
    %c0_i32_14 = arith.constant 0 : i32
    %28 = arith.cmpi eq, %arg2, %c0_i32_14 : i32
    %29 = arith.extui %28 : i1 to i32
    %c0_i32_15 = arith.constant 0 : i32
    %30 = arith.cmpi ne, %29, %c0_i32_15 : i32
    scf.if %30 {
      %cst_28 = arith.constant 0.000000e+00 : f32
      %51 = vector.broadcast %cst_28 : f32 to vector<128x128xf32>
      %c0_29 = arith.constant 0 : index
      %c0_30 = arith.constant 0 : index
      %52 = vector.load %arg9[%c0_29, %c0_30] : memref<128x128xf32, #tpu.memory_space<vmem>>, vector<128x128xf32>
      tpu.vector_store %arg9[%c0_29, %c0_30], %51 {strides = array<i32>} : memref<128x128xf32, #tpu.memory_space<vmem>>, vector<128x128xf32>,
    } else {
    }
    %c128_i32 = arith.constant 128 : i32
    %31 = arith.muli %16, %c128_i32 : i32
    %c128_i32_16 = arith.constant 128 : i32
    %32 = arith.muli %arg2, %c128_i32_16 : i32
    %33 = arith.addi %31, %32 : i32
    %34 = tpu.assume_multiple %33, 128 : i32
    %35 = arith.index_cast %34 : i32 to index
    %c0 = arith.constant 0 : index
    %36 = vector.load %arg7[%35, %c0] : memref<256x128xbf16, #tpu.memory_space<vmem>>, vector<128x128xbf16>
    %c0_17 = arith.constant 0 : index
    %c0_18 = arith.constant 0 : index
    %37 = vector.load %arg4[%c0_17, %c0_18] : memref<128x128xi8, #tpu.memory_space<vmem>>, vector<128x128xi8>
    %38 = arith.sitofp %37 : vector<128x128xi8> to vector<128x128xbf16>
    %c0_19 = arith.constant 0 : index
    %c0_20 = arith.constant 0 : index
    %39 = vector.load %arg9[%c0_19, %c0_20] : memref<128x128xf32, #tpu.memory_space<vmem>>, vector<128x128xf32>
    %cst = arith.constant dense<0.000000e+00> : vector<128x128xf32>
    %40 = tpu.matmul %38, %36, %cst {dimension_numbers = #tpu.dot_dimension_numbers<[1], [0], [0], [1], [0, 0, 1, 1], [], []>} : vector<128x128xbf16>, vector<128x128xbf16>, vector<128x128xf32> -> vector<128x128xf32>
    %41 = arith.addf %39, %40 : vector<128x128xf32>
    %c0_21 = arith.constant 0 : index
    %c0_22 = arith.constant 0 : index
    %42 = vector.load %arg9[%c0_21, %c0_22] : memref<128x128xf32, #tpu.memory_space<vmem>>, vector<128x128xf32>
    tpu.vector_store %arg9[%c0_21, %c0_22], %41 {strides = array<i32>} : memref<128x128xf32, #tpu.memory_space<vmem>>, vector<128x128xf32>,
    %c0_i32_23 = arith.constant 0 : i32
    %43 = arith.cmpi eq, %arg2, %c0_i32_23 : i32
    %44 = arith.extui %43 : i1 to i32
    %c0_i32_24 = arith.constant 0 : i32
    %45 = arith.cmpi ne, %44, %c0_i32_24 : i32
    scf.if %45 {
      %c0_28 = arith.constant 0 : index
      %c0_29 = arith.constant 0 : index
      %51 = vector.load %arg9[%c0_28, %c0_29] : memref<128x128xf32, #tpu.memory_space<vmem>>, vector<128x128xf32>
      %c0_30 = arith.constant 0 : index
      %c0_31 = arith.constant 0 : index
      %52 = vector.load %arg5[%c0_30, %c0_31] : memref<128x1xf32, #tpu.memory_space<vmem>>, vector<128x1xf32>
      %53 = vector.broadcast %52 : vector<128x1xf32> to vector<128x128xf32>
      %54 = arith.mulf %51, %53 : vector<128x128xf32>
      %c128_i32_32 = arith.constant 128 : i32
      %55 = arith.muli %27, %c128_i32_32 : i32
      %c128_i32_33 = arith.constant 128 : i32
      %56 = arith.muli %arg1, %c128_i32_33 : i32
      %57 = arith.addi %55, %56 : i32
      %58 = tpu.assume_multiple %57, 128 : i32
      %59 = arith.truncf %54 : vector<128x128xf32> to vector<128x128xbf16>
      %60 = arith.index_cast %58 : i32 to index
      %c0_34 = arith.constant 0 : index
      %61 = vector.load %arg7[%60, %c0_34] : memref<256x128xbf16, #tpu.memory_space<vmem>>, vector<128x128xbf16>
      tpu.vector_store %arg7[%60, %c0_34], %59 {strides = array<i32>} : memref<256x128xbf16, #tpu.memory_space<vmem>>, vector<128x128xbf16>,
      %c128_i32_35 = arith.constant 128 : i32
      %62 = arith.muli %arg1, %c128_i32_35 : i32
      %63 = tpu.assume_multiple %62, 128 : i32
      %64 = arith.index_cast %63 : i32 to index
      %c0_36 = arith.constant 0 : index
      %65 = vector.load %arg8[%64, %c0_36] : memref<128x128xf32, #tpu.memory_space<vmem>>, vector<128x128xf32>
      %66 = arith.addf %65, %54 : vector<128x128xf32>
      %67 = arith.index_cast %63 : i32 to index
      %c0_37 = arith.constant 0 : index
      %68 = vector.load %arg8[%67, %c0_37] : memref<128x128xf32, #tpu.memory_space<vmem>>, vector<128x128xf32>
      tpu.vector_store %arg8[%67, %c0_37], %66 {strides = array<i32>} : memref<128x128xf32, #tpu.memory_space<vmem>>, vector<128x128xf32>,
    } else {
    }
    %c0_i32_25 = arith.constant 0 : i32
    %46 = arith.cmpi eq, %arg2, %c0_i32_25 : i32
    %c1_i32_26 = arith.constant 1 : i32
    %47 = arith.cmpi eq, %arg0, %c1_i32_26 : i32
    %48 = arith.andi %46, %47 : i1
    %49 = arith.extui %48 : i1 to i32
    %c0_i32_27 = arith.constant 0 : i32
    %50 = arith.cmpi ne, %49, %c0_i32_27 : i32
    scf.if %50 {
      %c128_i32_28 = arith.constant 128 : i32
      %51 = arith.muli %arg1, %c128_i32_28 : i32
      %52 = tpu.assume_multiple %51, 128 : i32
      %53 = arith.index_cast %52 : i32 to index
      %c0_29 = arith.constant 0 : index
      %54 = vector.load %arg8[%53, %c0_29] : memref<128x128xf32, #tpu.memory_space<vmem>>, vector<128x128xf32>
      %cst_30 = arith.constant 0.333333343 : f32
      %55 = vector.broadcast %cst_30 : f32 to vector<128x128xf32>
      %56 = arith.mulf %54, %55 : vector<128x128xf32>
      %c0_31 = arith.constant 0 : index
      %c0_32 = arith.constant 0 : index
      %57 = vector.load %arg6[%c0_31, %c0_32] : memref<128x128xf32, #tpu.memory_space<vmem>>, vector<128x128xf32>
      tpu.vector_store %arg6[%c0_31, %c0_32], %56 {strides = array<i32>} : memref<128x128xf32, #tpu.memory_space<vmem>>, vector<128x128xf32>,
    } else {
    }
    return
  }
  func.func @transform_1(%arg0: i32, %arg1: i32, %arg2: i32) -> (i32, i32) {
    %c0_i32 = arith.constant 0 : i32
    return %arg1, %arg2 : i32, i32
  }
  func.func @transform_2(%arg0: i32, %arg1: i32, %arg2: i32) -> (i32, i32) {
    %c0_i32 = arith.constant 0 : i32
    %c0_i32_0 = arith.constant 0 : i32
    return %arg1, %c0_i32 : i32, i32
  }
  func.func @transform_3(%arg0: i32, %arg1: i32, %arg2: i32) -> (i32, i32) {
    %c0_i32 = arith.constant 0 : i32
    %c0_i32_0 = arith.constant 0 : i32
    return %arg1, %c0_i32 : i32, i32
  }
}

</mosaic_0001>

<bundles_post_ra>
// kernel: tpu_custom_call.1
= control target key start
LH: loop header
LB: loop body
LE: loop exit
PB: predicated region body
PF: predicated region fallthrough
CT: control target
= control target key end

     0   :  { %8 = vsyncpa [#allocation6], 0  ;;  %s1617_s0 = inlined_call_operand.vmem [shape: bf16[256,128], index: 0, kind: input, shape index: {}]   ;;  %s1618_s1 = inlined_call_operand.hbm [shape: s8[128,128], index: 1, kind: input, shape index: {}]   ;;  %s1619_s2 = inlined_call_operand.vmem [shape: f32[128,1], index: 2, kind: input, shape index: {}]   ;;  %s1620_s3 = inlined_call_operand.hbm [shape: f32[128,128], index: 3, kind: output, shape index: {}]  }
   0x1   :  { %9 = vsyncpa [#allocation7], 0  ;;  %s1398_s12 = smov 0   ;;  %s1400_s13 = smov 0  }
   0x2   :  { %s1402_s14 = smov 0  }
   0x3 LB: > { %s1014_s15 = sadd.s32 4294967295, %s1369_s14   ;;  %s34_s16 = sadd.s32 1, %s1365_s13  ;;  %s1369_s14 = sphi %s1402_s14, %s15_s14   ;;  %s1365_s13 = sphi %s1400_s13, %s1625_s13   ;;  %s1361_s12 = sphi %s1398_s12, %s1624_s12  }
   0x4   : > { %p36_p0 = scmp.ge.s32.totalorder %s34_s16, 2  ;;  %p1015_p1 = scmp.ge.s32.totalorder %s1369_s14, 1 }
   0x5   : > { %p119_p2 = scmp.lt.s32.totalorder %s1369_s14, 3  ;;  %p1425_p4 = scmp.eq.s32.totalorder %s1014_s15, 0 }
   0x6   : > { %s1627_s16 = smov (%p36_p0, %s34_s16), 0  ;;  %s1371_s19 = smov [#allocation5]  }
   0x7   : > { %p1419_p3 = pnand %p1015_p1, %p119_p2  ;;  %s135_s20 = sshll.u32 %s1371_s19, 4  ;;  %s136_s20 = int_to_ptr.vmem [resolvable:$true] %s135_s20 }
   0x8   : > { %s1298_s21 = scalar_lea.vmem %s136_s20, 512  ;;  %p1306_p11 = scmp.lt.s32.totalorder %s136_s20, %s136_s20 }
   0x9   : > { %p1238_p5 = pneg %p1419_p3  ;;  %p1299_p8 = scmp.ne.s32.totalorder %s136_s20, %s1298_s21 }
   0xa   : > { %p1307_p12 = scmp.lt.s32.totalorder %s1298_s21, %s1298_s21 }
   0xb   : > { %p1239_p6 = pnand %p1425_p4, %p1238_p5 }
   0xc   : > { %p1308_p13 = por %p1307_p12, %p1306_p11 }
   0xd   : > { %p1289_p7 = pneg %p1239_p6 }
   0xf   : > { %p1301_p9 = pnand %p1299_p8, %p1289_p7 }
  0x11   : > { %p1302_p10 = pneg %p1301_p9 }
  0x13   : > { %p1309_p0 = pnand %p1308_p13, %p1302_p10 }
  0x15   : > { %1312 = shalt.err (!%p1309_p0)
}
  0x16   : > { %s1372_s22 = smov 128   ;;  %s1373_s23 = smov 8  }
  0x17   : > { %1241 = dma.hbm_to_vmem [thread:$0]  (!%p1239_p6), %s1618_s1, 512, %s136_s20, [#allocation6], %s1372_s22, %s1372_s22, %s1373_s23  }
  0x18   : > { %160 = sbr.rel (%p1419_p3) target bundleno = 344 (0x158), region = 28 }
  0x1d   : > { %1350 = dma.done.wait (%p1425_p4), [#allocation6], 512  }
  0x1e   : > { %1352 = vsyncadd (%p1425_p4), [#allocation6], 4294966784  ;;  %p186_p1 = scmp.eq.s32.totalorder %s1361_s12, 0 }
  0x20   : > { %194 = sbr.rel (!%p186_p1) target bundleno = 59 (0x3b), region = 36 }
  0x25   : > { %v228_v0 = vld [vmem:[%s1617_s0] sm:$0xff]  ;;  %v230_v1 = vld [vmem:[%s1617_s0 + $0x8] sm:$0xff]  ;;  %v232_v2 = vld [vmem:[%s1617_s0 + $0x10] sm:$0xff] }
  0x26   : > { %229 = vst [vmem:[#allocation2] sm:$0xff] %v228_v0  ;;  %231 = vst [vmem:[#allocation2 + $0x8] sm:$0xff] %v230_v1  ;;  %v234_v3 = vld [vmem:[%s1617_s0 + $0x18] sm:$0xff]  ;;  %v236_v4 = vld [vmem:[%s1617_s0 + $0x20] sm:$0xff] }
  0x27   : > { %233 = vst [vmem:[#allocation2 + $0x10] sm:$0xff] %v232_v2  ;;  %v238_v5 = vld [vmem:[%s1617_s0 + $0x28] sm:$0xff]  ;;  %235 = vst [vmem:[#allocation2 + $0x18] sm:$0xff] %v234_v3  ;;  %v240_v6 = vld [vmem:[%s1617_s0 + $0x30] sm:$0xff] }
  0x28   : > { %237 = vst [vmem:[#allocation2 + $0x20] sm:$0xff] %v236_v4  ;;  %239 = vst [vmem:[#allocation2 + $0x28] sm:$0xff] %v238_v5  ;;  %v242_v7 = vld [vmem:[%s1617_s0 + $0x38] sm:$0xff]  ;;  %v244_v8 = vld [vmem:[%s1617_s0 + $0x40] sm:$0xff] }
  0x29   : > { %241 = vst [vmem:[#allocation2 + $0x30] sm:$0xff] %v240_v6  ;;  %243 = vst [vmem:[#allocation2 + $0x38] sm:$0xff] %v242_v7  ;;  %v246_v9 = vld [vmem:[%s1617_s0 + $0x48] sm:$0xff]  ;;  %v248_v10 = vld [vmem:[%s1617_s0 + $0x50] sm:$0xff] }
  0x2a   : > { %245 = vst [vmem:[#allocation2 + $0x40] sm:$0xff] %v244_v8  ;;  %v250_v11 = vld [vmem:[%s1617_s0 + $0x58] sm:$0xff]  ;;  %247 = vst [vmem:[#allocation2 + $0x48] sm:$0xff] %v246_v9  ;;  %v252_v12 = vld [vmem:[%s1617_s0 + $0x60] sm:$0xff] }
  0x2b   : > { %249 = vst [vmem:[#allocation2 + $0x50] sm:$0xff] %v248_v10  ;;  %251 = vst [vmem:[#allocation2 + $0x58] sm:$0xff] %v250_v11  ;;  %v254_v13 = vld [vmem:[%s1617_s0 + $0x68] sm:$0xff]  ;;  %v256_v14 = vld [vmem:[%s1617_s0 + $0x70] sm:$0xff] }
  0x2c   : > { %253 = vst [vmem:[#allocation2 + $0x60] sm:$0xff] %v252_v12  ;;  %255 = vst [vmem:[#allocation2 + $0x68] sm:$0xff] %v254_v13  ;;  %v258_v15 = vld [vmem:[%s1617_s0 + $0x78] sm:$0xff] }
  0x2d   : > { %257 = vst [vmem:[#allocation2 + $0x70] sm:$0xff] %v256_v14  ;;  %259 = vst [vmem:[#allocation2 + $0x78] sm:$0xff] %v258_v15 }
  0x2e   : > { %267 = vsyncadd [#allocation9], 2048 }
  0x2f   : > { %1353 = dma.done.wait [#allocation9], 2048 }
  0x30   : > { %1354 = vsyncadd [#allocation9], 4294965248  ;;  %v1081_v16 = vld [vmem:[#allocation2] sm:$0xff]   ;;  %v1152_v17 = vld [vmem:[#allocation2 + $0x8] sm:$0xff]  }
  0x31   : > { %v1153_v18 = vld [vmem:[#allocation2 + $0x10] sm:$0xff]   ;;  %v1082_v19 = vunpack.c.l.bf16 %v1081_v16  ;;  %v1083_v20 = vunpack.c.h.bf16 %v1081_v16  ;;  %v1086_v21 = vunpack.c.l.bf16 %v1152_v17  ;;  %v1087_v22 = vunpack.c.h.bf16 %v1152_v17  ;;  %v1154_v23 = vld [vmem:[#allocation2 + $0x18] sm:$0xff]   ;;  %v1155_v24 = vld [vmem:[#allocation2 + $0x20] sm:$0xff]  }
  0x32   : > { %v1156_v25 = vld [vmem:[#allocation2 + $0x28] sm:$0xff]   ;;  %v1090_v26 = vunpack.c.l.bf16 %v1153_v18  ;;  %v1091_v27 = vunpack.c.h.bf16 %v1153_v18  ;;  %v1094_v28 = vunpack.c.l.bf16 %v1154_v23  ;;  %v1095_v29 = vunpack.c.h.bf16 %v1154_v23  ;;  %v1157_v30 = vld [vmem:[#allocation2 + $0x30] sm:$0xff]   ;;  %v1158_v31 = vld [vmem:[#allocation2 + $0x38] sm:$0xff]  }
  0x33   : > { %304 = vst [vmem:[#allocation3 + $0x30] sm:$0xff] %v1082_v19  ;;  %305 = vst [vmem:[#allocation3] sm:$0xff] %v1083_v20  ;;  %v1098_v32 = vunpack.c.l.bf16 %v1155_v24  ;;  %v1099_v33 = vunpack.c.h.bf16 %v1155_v24  ;;  %v1102_v34 = vunpack.c.l.bf16 %v1156_v25  ;;  %v1103_v35 = vunpack.c.h.bf16 %v1156_v25 }
  0x34   : > { %306 = vst [vmem:[#allocation3 + $0x58] sm:$0xff] %v1086_v21  ;;  %307 = vst [vmem:[#allocation3 + $0x18] sm:$0xff] %v1087_v22  ;;  %v1106_v36 = vunpack.c.l.bf16 %v1157_v30  ;;  %v1107_v37 = vunpack.c.h.bf16 %v1157_v30  ;;  %v1110_v38 = vunpack.c.l.bf16 %v1158_v31  ;;  %v1111_v39 = vunpack.c.h.bf16 %v1158_v31 }
  0x35   : > { %308 = vst [vmem:[#allocation3 + $0x50] sm:$0xff] %v1090_v26  ;;  %309 = vst [vmem:[#allocation3 + $0x68] sm:$0xff] %v1091_v27 }
  0x36   : > { %310 = vst [vmem:[#allocation3 + $0x8] sm:$0xff] %v1094_v28  ;;  %311 = vst [vmem:[#allocation3 + $0x48] sm:$0xff] %v1095_v29 }
  0x37   : > { %312 = vst [vmem:[#allocation3 + $0x40] sm:$0xff] %v1098_v32  ;;  %313 = vst [vmem:[#allocation3 + $0x20] sm:$0xff] %v1099_v33 }
  0x38   : > { %314 = vst [vmem:[#allocation3 + $0x10] sm:$0xff] %v1102_v34  ;;  %315 = vst [vmem:[#allocation3 + $0x38] sm:$0xff] %v1103_v35 }
  0x39   : > { %316 = vst [vmem:[#allocation3 + $0x60] sm:$0xff] %v1106_v36  ;;  %317 = vst [vmem:[#allocation3 + $0x70] sm:$0xff] %v1107_v37 }
  0x3a   : > { %318 = vst [vmem:[#allocation3 + $0x78] sm:$0xff] %v1110_v38  ;;  %319 = vst [vmem:[#allocation3 + $0x28] sm:$0xff] %v1111_v39 }
  0x3b PF: > { %p320_p2 = scmp.lt.s32.totalorder %s1361_s12, 0  ;;  %s321_s9 = ssub.s32 0, %s1361_s12  ;;  %v1493_v40 = vld [vmem:[#allocation5] sm:$0xff]  ;;  %v1495_v41 = vld [vmem:[#allocation5 + $0x10] sm:$0xff]  ;;  %v1374_v44 = vmov 0   ;;  %v614_v47 = vld [vmem:[%s1619_s2 + $0x18] sm:$0xff] }
  0x3c   : > { %s1022_s10 = smin.u32 %s1361_s12, %s321_s9  ;;  %v391_v42 = vunpack.c.l.s8.bf16 %v1493_v40  ;;  %v395_v43 = vunpack.c.l.s8.bf16 %v1495_v41  ;;  %1278 = vset.pattern.permute.xlu1 %v1374_v44  ;;  %1277 = vset.pattern.permute.xlu0 %v1374_v44  ;;  %v613_v45 = vld [vmem:[%s1619_s2 + $0x10] sm:$0xff]  ;;  %v611_v46 = vld [vmem:[%s1619_s2] sm:$0xff]  ;;  %v612_v48 = vld [vmem:[%s1619_s2 + $0x8] sm:$0xff]  ;;  %v392_v7 = vunpack.c.h.s8.bf16 %v1493_v40  ;;  %v396_v8 = vunpack.c.h.s8.bf16 %v1495_v41  ;;  %p859_p4 = scmp.eq.s32.totalorder %s1361_s12, 1 }
  0x3d   : > { %s323_s20 = sand.u32 1, %s1022_s10   ;;  %639 = vperm.xlu1 %1278, %v613_v45   ;;  %629 = vperm.xlu0 %1277, %v611_v46   ;;  %v616_v49 = vld [vmem:[%s1619_s2 + $0x28] sm:$0xff]  ;;  %v615_v50 = vld [vmem:[%s1619_s2 + $0x20] sm:$0xff]  ;;  %v618_v51 = vld [vmem:[%s1619_s2 + $0x38] sm:$0xff]  ;;  %s332_s6 = sadd.s32 1, %s1361_s12 }
  0x3e   : > { %s324_s21 = ssub.s32 0, %s323_s20  ;;  %1198 = vmatprep.mubr.bf16.mxu0 %v391_v42  ;;  %1206 = vmatprep.mubr.bf16.mxu1 %v395_v43  ;;  %v617_v52 = vld [vmem:[%s1619_s2 + $0x30] sm:$0xff]  ;;  %v620_v54 = vld [vmem:[%s1619_s2 + $0x48] sm:$0xff]  ;;  %v619_v56 = vld [vmem:[%s1619_s2 + $0x40] sm:$0xff]  ;;  %s334_s7 = ssub.s32 0, %s332_s6 }
  0x3f   : > { %s1629_s21 = smov (!%p320_p2, %s324_s21), %s323_s20  ;;  %v622_v58 = vld [vmem:[%s1619_s2 + $0x58] sm:$0xff]  ;;  %v621_v59 = vld [vmem:[%s1619_s2 + $0x50] sm:$0xff]  ;;  %v624_v61 = vld [vmem:[%s1619_s2 + $0x68] sm:$0xff]  ;;  %s1025_s8 = smin.u32 %s334_s7, %s332_s6 }
  0x40   : > { %p1024_p3 = scmp.lt.s32.totalorder %s1629_s21, 0  ;;  %s330_s26 = sadd.s32 2, %s1629_s21  ;;  %v623_v62 = vld [vmem:[%s1619_s2 + $0x60] sm:$0xff]  ;;  %v626_v0 = vld [vmem:[%s1619_s2 + $0x78] sm:$0xff]  ;;  %v625_v1 = vld [vmem:[%s1619_s2 + $0x70] sm:$0xff] }
  0x41   : > { %644 = vperm.xlu1 %1278, %v614_v47   ;;  %634 = vperm.xlu0 %1277, %v612_v48   ;;  %v388_v5 = vld [vmem:[#allocation5 + $0x8] sm:$0xff]  ;;  %v390_v6 = vld [vmem:[#allocation5 + $0x18] sm:$0xff]  ;;  %s336_s9 = sand.u32 1, %s1025_s8   ;;  %p333_p5 = scmp.lt.s32.totalorder %s332_s6, 0  ;;  %v821_v28 = vld [vmem:[#allocation3 + $0x10] sm:$0xff] }
  0x42   : > { %s1631_s26 = smov (!%p1024_p3, %s330_s26), %s1629_s21  ;;  %v393_v9 = vunpack.c.l.s8.bf16 %v388_v5  ;;  %v397_v10 = vunpack.c.l.s8.bf16 %v390_v6  ;;  %v394_v11 = vunpack.c.h.s8.bf16 %v388_v5  ;;  %v398_v12 = vunpack.c.h.s8.bf16 %v390_v6  ;;  %v813_v26 = vld [vmem:[#allocation3 + $0x58] sm:$0xff]  ;;  %v811_v33 = vld [vmem:[#allocation3 + $0x30] sm:$0xff]  ;;  %v819_v35 = vld [vmem:[#allocation3 + $0x40] sm:$0xff] }
  0x43   : > { %s1028_s4 = sshll.u32 %s1631_s26, 7  ;;  %v814_v41 = vld [vmem:[#allocation3 + $0x18] sm:$0xff] }
  0x44   : > { %s367_s5 = sshra.s32 %s1028_s4, 3  ;;  %v822_v43 = vld [vmem:[#allocation3 + $0x38] sm:$0xff] }
  0x45   : > { %654 = vperm.xlu1 %1278, %v616_v49   ;;  %649 = vperm.xlu0 %1277, %v615_v50   ;;  %s1029_s10 = sshll.u32 %s367_s5, 2 }
  0x46   : > { %s1526_s11 = scalar_lea.vmem [#allocation2], %s1029_s10  ;;  %s337_s10 = ssub.s32 0, %s336_s9 }
  0x47   : > { %v1279_v53 = vld [vmem:[%s1526_s11 + $0x38] sm:$0xff]   ;;  %v1280_v55 = vld [vmem:[%s1526_s11 + $0x30] sm:$0xff]   ;;  %v1281_v57 = vld [vmem:[%s1526_s11 + $0x28] sm:$0xff]   ;;  %s1633_s10 = smov (!%p333_p5, %s337_s10), %s336_s9 }
  0x48   : > { %1182 = vmatprep.subr.bf16.mxu0 %v1279_v53  ;;  %1214 = vmatprep.subr.bf16.mxu1 %v1279_v53  ;;  %v1282_v60 = vld [vmem:[%s1526_s11 + $0x20] sm:$0xff]   ;;  %v1283_v63 = vld [vmem:[%s1526_s11 + $0x18] sm:$0xff]   ;;  %v1284_v2 = vld [vmem:[%s1526_s11 + $0x10] sm:$0xff]   ;;  %p1027_p6 = scmp.lt.s32.totalorder %s1633_s10, 0 }
  0x49   : > { %664 = vperm.xlu1 %1278, %v618_v51   ;;  %659 = vperm.xlu0 %1277, %v617_v52   ;;  %v1285_v3 = vld [vmem:[%s1526_s11 + $0x8] sm:$0xff]   ;;  %v1286_v4 = vld [vmem:[%s1526_s11] sm:$0xff]   ;;  %s343_s11 = sadd.s32 2, %s1633_s10 }
  0x4a   : > { %1183 = vmatpush3.bf16.msra.mxu0 %v1279_v53  ;;  %1222 = vmatpush3.bf16.msra.mxu1 %v1279_v53  ;;  %s1635_s11 = smov (!%p1027_p6, %s343_s11), %s1633_s10 }
  0x4b   : > { %1184 = vmatprep.subr.bf16.mxu0 %v1280_v55  ;;  %1215 = vmatprep.subr.bf16.mxu1 %v1280_v55  ;;  %s1038_s17 = sshll.u32 %s1635_s11, 7 }
  0x4c   : > { %s1570_s18 = sshra.s32 %s1038_s17, 3 }
  0x4d   : > { %674 = vperm.xlu1 %1278, %v620_v54   ;;  %669 = vperm.xlu0 %1277, %v619_v56   ;;  %s1055_s19 = sshll.u32 %s1570_s18, 2  ;;  %v812_v56 = vld [vmem:[#allocation3] sm:$0xff] }
  0x4e   : > { %1185 = vmatpush3.bf16.msra.mxu0 %v1280_v55  ;;  %1223 = vmatpush3.bf16.msra.mxu1 %v1280_v55  ;;  %s1575_s20 = scalar_lea.vmem [#allocation2], %s1055_s19 }
  0x4f   : > { %1186 = vmatprep.subr.bf16.mxu0 %v1281_v57  ;;  %1216 = vmatprep.subr.bf16.mxu1 %v1281_v57 }
  0x51   : > { %684 = vperm.xlu1 %1278, %v622_v58   ;;  %679 = vperm.xlu0 %1277, %v621_v59  }
  0x52   : > { %1187 = vmatpush3.bf16.msra.mxu0 %v1281_v57  ;;  %1224 = vmatpush3.bf16.msra.mxu1 %v1281_v57  ;;  %v820_v57 = vld [vmem:[#allocation3 + $0x20] sm:$0xff] }
  0x53   : > { %1188 = vmatprep.subr.bf16.mxu0 %v1282_v60  ;;  %1217 = vmatprep.subr.bf16.mxu1 %v1282_v60 }
  0x55   : > { %694 = vperm.xlu1 %1278, %v624_v61   ;;  %689 = vperm.xlu0 %1277, %v623_v62   ;;  %v817_v61 = vld [vmem:[#allocation3 + $0x8] sm:$0xff] }
  0x56   : > { %1189 = vmatpush3.bf16.msra.mxu0 %v1282_v60  ;;  %1225 = vmatpush3.bf16.msra.mxu1 %v1282_v60 }
  0x57   : > { %1190 = vmatprep.subr.bf16.mxu0 %v1283_v63  ;;  %1218 = vmatprep.subr.bf16.mxu1 %v1283_v63 }
  0x59   : > { %704 = vperm.xlu1 %1278, %v626_v0   ;;  %699 = vperm.xlu0 %1277, %v625_v1  }
  0x5a   : > { %1191 = vmatpush3.bf16.msra.mxu0 %v1283_v63  ;;  %1226 = vmatpush3.bf16.msra.mxu1 %v1283_v63  ;;  %v825_v63 = vld [vmem:[#allocation3 + $0x78] sm:$0xff] }
  0x5b   : > { %1192 = vmatprep.subr.bf16.mxu0 %v1284_v2  ;;  %1219 = vmatprep.subr.bf16.mxu1 %v1284_v2 }
  0x5e   : > { %1193 = vmatpush3.bf16.msra.mxu0 %v1284_v2  ;;  %1227 = vmatpush3.bf16.msra.mxu1 %v1284_v2 }
  0x5f   : > { %1194 = vmatprep.subr.bf16.mxu0 %v1285_v3  ;;  %1220 = vmatprep.subr.bf16.mxu1 %v1285_v3 }
  0x62   : > { %1195 = vmatpush3.bf16.msra.mxu0 %v1285_v3  ;;  %1228 = vmatpush3.bf16.msra.mxu1 %v1285_v3 }
  0x63   : > { %1196 = vmatprep.subr.bf16.mxu0 %v1286_v4  ;;  %1221 = vmatprep.subr.bf16.mxu1 %v1286_v4 }
  0x66   : > { %1197 = vmatpush3.bf16.msra.mxu0 %v1286_v4  ;;  %1229 = vmatpush3.bf16.msra.mxu1 %v1286_v4 }
  0x69   : > { %1199 = vmatmul.mubr.bf16.vlgmr.msra.gmra.mxu0 %v392_v7  ;;  %1207 = vmatmul.mubr.bf16.vlgmr.msra.gmra.mxu1 %v396_v8  ;;  %v815_v7 = vld [vmem:[#allocation3 + $0x50] sm:$0xff] }
  0x6a   : > { %1202 = vmatprep.mubr.bf16.mxu0 %v393_v9  ;;  %1210 = vmatprep.mubr.bf16.mxu1 %v397_v10  ;;  %v823_v9 = vld [vmem:[#allocation3 + $0x60] sm:$0xff] }
  0x71   : > { %1203 = vmatmul.mubr.bf16.gmra.mxu0 %v394_v11  ;;  %1211 = vmatmul.mubr.bf16.gmra.mxu1 %v398_v12 }
  0xb8   : > { %v630_v13 = vpop.permute.xlu0 %629  ;;  %v640_v14 = vpop.permute.xlu1 %639 }
  0xbc   : > { %v635_v15 = vpop.permute.xlu0 %634  ;;  %v645_v16 = vpop.permute.xlu1 %644 }
  0xc0   : > { %v1564_v17 = vpop.permute.xlu0 %649  ;;  %v1566_v18 = vpop.permute.xlu1 %654 }
  0xc4   : > { %v660_v19 = vpop.permute.xlu0 %659  ;;  %v1568_v20 = vpop.permute.xlu1 %664 }
  0xc8   : > { %v670_v21 = vpop.permute.xlu0 %669  ;;  %v675_v22 = vpop.permute.xlu1 %674 }
  0xcc   : > { %v680_v23 = vpop.permute.xlu0 %679  ;;  %v685_v24 = vpop.permute.xlu1 %684 }
  0xd0   : > { %v690_v29 = vpop.permute.xlu0 %689  ;;  %v1573_v44 = vpop.permute.xlu1 %694 }
  0xd4   : > { %v700_v51 = vpop.permute.xlu0 %699  ;;  %v705_v10 = vpop.permute.xlu1 %704 }
 0x129   : > { %v1200_v25 = vpop.f32.mrf.mxu0  ;;  %v1208_v27 = vpop.f32.mrf.mxu1 }
 0x12a   : > { %v709_v30 = vmul.f32 %v1200_v25, %v640_v14  ;;  %v717_v31 = vmul.f32 %v1208_v27, %v680_v23 }
 0x12b   : > { %v497_v32 = vpop.f32.mrf.mxu0  ;;  %v529_v34 = vpop.f32.mrf.mxu1 }
 0x12c   : > { %v829_v36 = vadd.f32 %v813_v26, %v709_v30  ;;  %v837_v37 = vadd.f32 %v821_v28, %v717_v31  ;;  %v707_v38 = vmul.f32 %v630_v13, %v497_v32  ;;  %v715_v39 = vmul.f32 %v670_v21, %v529_v34  ;;  %v826_v21 = vld [vmem:[#allocation3 + $0x28] sm:$0xff]  ;;  %v824_v32 = vld [vmem:[#allocation3 + $0x70] sm:$0xff] }
 0x12d   : > { %v1201_v40 = vpop.f32.mrf.mxu0  ;;  %v1209_v42 = vpop.f32.mrf.mxu1 }
 0x12e   : > { %845 = vst [vmem:[#allocation3 + $0x58] sm:$0xff] %v829_v36  ;;  %853 = vst [vmem:[#allocation3 + $0x10] sm:$0xff] %v837_v37  ;;  %v827_v45 = vadd.f32 %v811_v33, %v707_v38  ;;  %v835_v46 = vadd.f32 %v819_v35, %v715_v39  ;;  %v710_v47 = vmul.f32 %v1201_v40, %v645_v16  ;;  %v818_v16 = vld [vmem:[#allocation3 + $0x48] sm:$0xff] }
 0x12f   : > { %v718_v48 = vmul.f32 %v1209_v42, %v685_v24  ;;  %v500_v49 = vpop.f32.mrf.mxu0  ;;  %v532_v50 = vpop.f32.mrf.mxu1 }
 0x130   : > { %843 = vst [vmem:[#allocation3 + $0x30] sm:$0xff] %v827_v45  ;;  %851 = vst [vmem:[#allocation3 + $0x40] sm:$0xff] %v835_v46  ;;  %v1120_v52 = vpack.c.bf16 %v710_v47, %v709_v30  ;;  %v830_v53 = vadd.f32 %v814_v41, %v710_v47  ;;  %v708_v58 = vmul.f32 %v635_v15, %v500_v49 }
 0x131   : > { %v1140_v54 = vpack.c.bf16 %v718_v48, %v717_v31  ;;  %v838_v55 = vadd.f32 %v822_v43, %v718_v48  ;;  %v716_v59 = vmul.f32 %v675_v22, %v532_v50  ;;  %v1204_v60 = vpop.f32.mrf.mxu0  ;;  %v1212_v62 = vpop.f32.mrf.mxu1  ;;  %v816_v31 = vld [vmem:[#allocation3 + $0x68] sm:$0xff] }
 0x132   : > { %1159 = vst [vmem:[%s1575_s20 + $0x8] sm:$0xff] %v1120_v52   ;;  %846 = vst [vmem:[#allocation3 + $0x18] sm:$0xff] %v830_v53  ;;  %v713_v0 = vmul.f32 %v1204_v60, %v660_v19  ;;  %v721_v1 = vmul.f32 %v1212_v62, %v700_v51  ;;  %v1115_v2 = vpack.c.bf16 %v708_v58, %v707_v38 }
 0x133   : > { %1163 = vst [vmem:[%s1575_s20 + $0x28] sm:$0xff] %v1140_v54   ;;  %854 = vst [vmem:[#allocation3 + $0x38] sm:$0xff] %v838_v55  ;;  %v828_v3 = vadd.f32 %v812_v56, %v708_v58  ;;  %v1135_v4 = vpack.c.bf16 %v716_v59, %v715_v39  ;;  %v836_v5 = vadd.f32 %v820_v57, %v716_v59  ;;  %v513_v6 = vpop.f32.mrf.mxu0  ;;  %v545_v8 = vpop.f32.mrf.mxu1 }
 0x134   : > { %v833_v11 = vadd.f32 %v817_v61, %v713_v0  ;;  %v841_v12 = vadd.f32 %v825_v63, %v721_v1  ;;  %v711_v13 = vmul.f32 %v1564_v17, %v513_v6  ;;  %v719_v14 = vmul.f32 %v690_v29, %v545_v8  ;;  %1116 = vst [vmem:[%s1575_s20] sm:$0xff] %v1115_v2  }
 0x135   : > { %844 = vst [vmem:[#allocation3] sm:$0xff] %v828_v3  ;;  %1162 = vst [vmem:[%s1575_s20 + $0x20] sm:$0xff] %v1135_v4   ;;  %v1205_v15 = vpop.f32.mrf.mxu0  ;;  %v1213_v19 = vpop.f32.mrf.mxu1  ;;  %v876_v56 = vld [vmem:[#allocation3 + $0x10] sm:$0xff] (%p859_p4) }
 0x136   : > { %852 = vst [vmem:[#allocation3 + $0x20] sm:$0xff] %v836_v5  ;;  %849 = vst [vmem:[#allocation3 + $0x8] sm:$0xff] %v833_v11  ;;  %v831_v22 = vadd.f32 %v815_v7, %v711_v13  ;;  %v839_v23 = vadd.f32 %v823_v9, %v719_v14  ;;  %v714_v24 = vmul.f32 %v1205_v15, %v1568_v20  ;;  %v892_v59 = vmul.f32 (%p859_p4), 0.33333334, %v876_v56 }
 0x137   : > { %857 = vst [vmem:[#allocation3 + $0x78] sm:$0xff] %v841_v12  ;;  %v722_v25 = vmul.f32 %v1213_v19, %v705_v10  ;;  %v516_v26 = vpop.f32.mrf.mxu0  ;;  %v548_v17 = vpop.f32.mrf.mxu1  ;;  %v866_v38 = vld [vmem:[#allocation3 + $0x30] sm:$0xff] (%p859_p4)  ;;  %v874_v51 = vld [vmem:[#allocation3 + $0x40] sm:$0xff] (%p859_p4) }
 0x138   : > { %847 = vst [vmem:[#allocation3 + $0x50] sm:$0xff] %v831_v22  ;;  %855 = vst [vmem:[#allocation3 + $0x60] sm:$0xff] %v839_v23  ;;  %v1130_v27 = vpack.c.bf16 %v714_v24, %v713_v0  ;;  %v834_v28 = vadd.f32 %v818_v16, %v714_v24  ;;  %v712_v33 = vmul.f32 %v1566_v18, %v516_v26  ;;  %v868_v18 = vld [vmem:[#allocation3 + $0x58] sm:$0xff] (%p859_p4)  ;;  %v882_v40 = vmul.f32 (%p859_p4), 0.33333334, %v866_v38 }
 0x139   : > { %v1150_v29 = vpack.c.bf16 %v722_v25, %v721_v1  ;;  %v842_v30 = vadd.f32 %v826_v21, %v722_v25  ;;  %v720_v34 = vmul.f32 %v1573_v44, %v548_v17  ;;  %863 = sbr.rel (!%p859_p4) target bundleno = 328 (0x148), region = 83  ;;  %v884_v42 = vmul.f32 (%p859_p4), 0.33333334, %v868_v18  ;;  %v869_v43 = vld [vmem:[#allocation3 + $0x18] sm:$0xff] (%p859_p4)  ;;  %908 = vst [vmem:[#allocation8 + $0x50] sm:$0xff] (%p859_p4), %v892_v59 }
 0x13a   : > { %1161 = vst [vmem:[%s1575_s20 + $0x18] sm:$0xff] %v1130_v27   ;;  %850 = vst [vmem:[#allocation3 + $0x48] sm:$0xff] %v834_v28  ;;  %v1125_v20 = vpack.c.bf16 %v712_v33, %v711_v13  ;;  %v832_v35 = vadd.f32 %v816_v31, %v712_v33  ;;  %v885_v46 = vmul.f32 (%p859_p4), 0.33333334, %v869_v43  ;;  %v890_v54 = vmul.f32 (%p859_p4), 0.33333334, %v874_v51 }
 0x13b   : > { %1165 = vst [vmem:[%s1575_s20 + $0x38] sm:$0xff] %v1150_v29   ;;  %858 = vst [vmem:[#allocation3 + $0x28] sm:$0xff] %v842_v30  ;;  %v1145_v36 = vpack.c.bf16 %v720_v34, %v719_v14  ;;  %v840_v37 = vadd.f32 %v824_v32, %v720_v34  ;;  %v877_v57 = vld [vmem:[#allocation3 + $0x38] sm:$0xff] (%p859_p4) }
 0x13c   : > { %1160 = vst [vmem:[%s1575_s20 + $0x10] sm:$0xff] %v1125_v20   ;;  %848 = vst [vmem:[#allocation3 + $0x68] sm:$0xff] %v832_v35  ;;  %v867_v39 = vld [vmem:[#allocation3] sm:$0xff] (%p859_p4)  ;;  %v893_v60 = vmul.f32 (%p859_p4), 0.33333334, %v877_v57 }
 0x13d   : > { %1164 = vst [vmem:[%s1575_s20 + $0x30] sm:$0xff] %v1145_v36   ;;  %856 = vst [vmem:[#allocation3 + $0x70] sm:$0xff] %v840_v37  ;;  %v883_v41 = vmul.f32 (%p859_p4), 0.33333334, %v867_v39  ;;  %v872_v49 = vld [vmem:[#allocation3 + $0x8] sm:$0xff] (%p859_p4)  ;;  %v875_v55 = vld [vmem:[#allocation3 + $0x20] sm:$0xff] (%p859_p4) }
 0x13e   : > { %898 = vst [vmem:[#allocation8] sm:$0xff] %v882_v40  ;;  %900 = vst [vmem:[#allocation8 + $0x10] sm:$0xff] %v884_v42  ;;  %v888_v52 = vmul.f32 0.33333334, %v872_v49  ;;  %v891_v58 = vmul.f32 0.33333334, %v875_v55 }
 0x13f   : > { %v870_v44 = vld [vmem:[#allocation3 + $0x50] sm:$0xff]  ;;  %899 = vst [vmem:[#allocation8 + $0x8] sm:$0xff] %v883_v41  ;;  %901 = vst [vmem:[#allocation8 + $0x18] sm:$0xff] %v885_v46  ;;  %v878_v61 = vld [vmem:[#allocation3 + $0x60] sm:$0xff] }
 0x140   : > { %v886_v47 = vmul.f32 0.33333334, %v870_v44  ;;  %904 = vst [vmem:[#allocation8 + $0x30] sm:$0xff] %v888_v52  ;;  %906 = vst [vmem:[#allocation8 + $0x40] sm:$0xff] %v890_v54  ;;  %v880_v63 = vld [vmem:[#allocation3 + $0x78] sm:$0xff] }
 0x141   : > { %v873_v50 = vld [vmem:[#allocation3 + $0x48] sm:$0xff]  ;;  %907 = vst [vmem:[#allocation8 + $0x48] sm:$0xff] %v891_v58  ;;  %909 = vst [vmem:[#allocation8 + $0x58] sm:$0xff] %v893_v60  ;;  %v894_v0 = vmul.f32 0.33333334, %v878_v61 }
 0x142   : > { %902 = vst [vmem:[#allocation8 + $0x20] sm:$0xff] %v886_v47  ;;  %v889_v53 = vmul.f32 0.33333334, %v873_v50  ;;  %v896_v2 = vmul.f32 0.33333334, %v880_v63  ;;  %v881_v3 = vld [vmem:[#allocation3 + $0x28] sm:$0xff] }
 0x143   : > { %v871_v45 = vld [vmem:[#allocation3 + $0x68] sm:$0xff]  ;;  %910 = vst [vmem:[#allocation8 + $0x60] sm:$0xff] %v894_v0  ;;  %v897_v4 = vmul.f32 0.33333334, %v881_v3 }
 0x144   : > { %v887_v48 = vmul.f32 0.33333334, %v871_v45  ;;  %905 = vst [vmem:[#allocation8 + $0x38] sm:$0xff] %v889_v53  ;;  %v879_v62 = vld [vmem:[#allocation3 + $0x70] sm:$0xff]  ;;  %912 = vst [vmem:[#allocation8 + $0x70] sm:$0xff] %v896_v2 }
 0x145   : > { %v895_v1 = vmul.f32 0.33333334, %v879_v62  ;;  %913 = vst [vmem:[#allocation8 + $0x78] sm:$0xff] %v897_v4 }
 0x146   : > { %903 = vst [vmem:[#allocation8 + $0x28] sm:$0xff] %v887_v48 }
 0x147   : > { %911 = vst [vmem:[#allocation8 + $0x68] sm:$0xff] %v895_v1 }
 0x148 PF: > { %p1593_p7 = scmp.eq.s32.totalorder %s1014_s15, 1  ;;  %s1375_s21 = smov [#allocation8]  }
 0x149   : > { %s923_s22 = sshll.u32 %s1375_s21, 4  ;;  %s924_s22 = int_to_ptr.vmem [resolvable:$true] %s923_s22 }
 0x14a   : > { %s1313_s23 = scalar_lea.vmem %s924_s22, 2048  ;;  %p1320_p11 = scmp.lt.s32.totalorder %s924_s22, %s924_s22 }
 0x14b   : > { %p1314_p8 = scmp.ne.s32.totalorder %s924_s22, %s1313_s23  ;;  %p1321_p12 = scmp.lt.s32.totalorder %s1313_s23, %s1313_s23 }
 0x14d   : > { %p1315_p9 = pnand %p1314_p8, %p1593_p7  ;;  %p1322_p13 = por %p1321_p12, %p1320_p11 }
 0x14f   : > { %p1316_p10 = pneg %p1315_p9 }
 0x151   : > { %p1323_p0 = pnand %p1322_p13, %p1316_p10 }
 0x153   : > { %1326 = shalt.err (!%p1323_p0)
}
 0x154   : > { %s1376_s24 = smov 128   ;;  %s1377_s15 = smov 8  }
 0x155   : > { %1235 = dma.vmem_to_hbm [thread:$0]  (%p1593_p7), %s924_s22, 2048, %s1620_s3, [#allocation7], %s1376_s24, %s1376_s24, %s1377_s15  }
 0x156   : > { %1356 = dma.done.wait (%p1593_p7), [#allocation7], 2048  }
 0x157   : > { %1358 = vsyncadd (%p1593_p7), [#allocation7], 4294965248 }
 0x158 PF: > { %s15_s14 = sadd.s32 1, %s1369_s14   ;;  %s1624_s12 = smov %s1365_s13 }
 0x159   : > { %p12_p1 = scmp.ge.s32.totalorder %s15_s14, 4   ;;  %s1625_s13 = smov %s1627_s16 }
 0x15b   :  { %14 = sbr.rel (!%p12_p1) target bundleno = 3 (0x3), region = 125 }
 0x160   :  { %939 = vsyncpa [#allocation6], 1 }
 0x161   :  { %941 = vsyncpa [#allocation6 + $0x1], 1 }
 0x162   :  { %942 = vsyncpa [#allocation7], 1 }
 0x163   :  { %944 = vsyncpa [#allocation7 + $0x1], 1 }

</bundles_post_ra>
